<compile_context>
chip_gen: v7x
topology: tpu7x:2x2x1
jax: 0.10.0
libtpu: 0.0.40
codegen_flags: <defaults>
</compile_context>

<pallas_src>
import functools

import jax
import jax.numpy as jnp
from jax.experimental import pallas as pl
from jax.experimental.pallas import tpu as pltpu

HIDDEN = 10  # fixed by the PyTorch model: every dense_layer / ffn input is width 10


def _round_up(x, m):
    return (x + m - 1) // m * m


def _mlp_kernel(img_ref, ext_ref,
                w1_ref, b1_ref,
                w2a_ref, w2b_ref, b2_ref,
                w3_ref, b3_ref,
                out_ref):
    # bf16 operands on the MXU, f32 accumulation, f32 element-wise math.
    img = img_ref[...]                                   # (bt, image_dim)  bf16
    ext = ext_ref[...]                                   # (bt, inner_dim)  bf16

    # layer_1: Linear(image_dim, 10) + ReLU
    h1 = jnp.dot(img, w1_ref[...], preferred_element_type=jnp.float32) + b1_ref[...]
    h1 = jnp.maximum(h1, 0.0)                            # f32

    # layer_2 on concat([h1, extras]) == h1 @ W2a + extras @ W2b, then bias + ReLU.
    # Both dots feed one f32 accumulator (in-place MRB accumulate on v7x).
    acc = jnp.dot(h1.astype(w2a_ref.dtype), w2a_ref[...],
                  preferred_element_type=jnp.float32)
    acc = acc + jnp.dot(ext, w2b_ref[...], preferred_element_type=jnp.float32)
    h2 = jnp.maximum(acc + b2_ref[...], 0.0)             # f32

    # ffn_layer: Linear(10, outer_dim_padded)  -- lane-dense (128-multiple) output
    out = jnp.dot(h2.astype(w3_ref.dtype), w3_ref[...],
                  preferred_element_type=jnp.float32) + b3_ref[...]
    out_ref[...] = out.astype(out_ref.dtype)


@functools.partial(jax.jit, static_argnames=("b_tile",))
def mymodel_forward(image_batch, extras_batch, params, *, b_tile=512):
    """Forward pass. image_batch: (B, image_dim) f32, extras_batch: (B, inner_dim) f32."""
    w1, b1, w2a, w2b, b2, w3, b3 = params
    B, image_dim = image_batch.shape
    inner_dim = extras_batch.shape[1]
    outer_dim = w3.shape[1]

    # ---- static layout decisions ----
    bt = min(b_tile, _round_up(B, 16))       # batch tile: multiple of 16 (bf16 sublanes)
    B_pad = _round_up(B, bt)                 # pad batch to a whole number of tiles
    out_pad = _round_up(outer_dim, 128)      # lane-dense output -> unmasked vector stores

    # bf16 for the bandwidth-bound operands (activations + weights); biases stay f32.
    img = jnp.pad(image_batch, ((0, B_pad - B), (0, 0))).astype(jnp.bfloat16)
    ext = jnp.pad(extras_batch, ((0, B_pad - B), (0, 0))).astype(jnp.bfloat16)
    w1_b = w1.astype(jnp.bfloat16)
    w2a_b = w2a.astype(jnp.bfloat16)
    w2b_b = w2b.astype(jnp.bfloat16)
    w3_p = jnp.pad(w3, ((0, 0), (0, out_pad - outer_dim))).astype(jnp.bfloat16)
    b3_p = jnp.pad(b3, ((0, 0), (0, out_pad - outer_dim)))        # f32

    grid = (B_pad // bt,)

    def resident(a):  # weights/biases: fully resident, same block every grid step
        return pl.BlockSpec(a.shape, lambda i: (0,) * a.ndim)

    out = pl.pallas_call(
        _mlp_kernel,
        out_shape=jax.ShapeDtypeStruct((B_pad, out_pad), jnp.float32),
        grid=grid,
        in_specs=[
            pl.BlockSpec((bt, image_dim), lambda i: (i, 0)),
            pl.BlockSpec((bt, inner_dim), lambda i: (i, 0)),
            resident(w1_b), resident(b1),
            resident(w2a_b), resident(w2b_b), resident(b2),
            resident(w3_p), resident(b3_p),
        ],
        out_specs=pl.BlockSpec((bt, out_pad), lambda i: (i, 0)),
        compiler_params=pltpu.CompilerParams(
            dimension_semantics=("parallel",)),   # batch tiles split across TCs (v7x)
    )(img, ext, w1_b, b1, w2a_b, w2b_b, b2, w3_p, b3_p)

    return out[:B, :outer_dim]


def init_params(key, image_dim, inner_dim, outer_dim):
    """Deterministic param init. Weights stored as [in, out].
    W2 split: w2a = rows for h1 (first 10 rows of torch W2), w2b = rows for extras."""
    k = jax.random.split(key, 7)
    w1 = jax.random.normal(k[0], (image_dim, HIDDEN), jnp.float32) * 0.1
    b1 = jax.random.normal(k[1], (1, HIDDEN), jnp.float32) * 0.1
    w2a = jax.random.normal(k[2], (HIDDEN, HIDDEN), jnp.float32) * 0.1
    w2b = jax.random.normal(k[3], (inner_dim, HIDDEN), jnp.float32) * 0.1
    b2 = jax.random.normal(k[4], (1, HIDDEN), jnp.float32) * 0.1
    w3 = jax.random.normal(k[5], (HIDDEN, outer_dim), jnp.float32) * 0.1
    b3 = jax.random.normal(k[6], (1, outer_dim), jnp.float32) * 0.1
    return (w1, b1, w2a, w2b, b2, w3, b3)


def reference_forward(image_batch, extras_batch, params):
    """Pure-JAX reference mirroring the PyTorch forward (concat order [h1, extras])
    with the same bf16 quantization of MXU operands as the kernel."""
    w1, b1, w2a, w2b, b2, w3, b3 = params
    bf = lambda x: x.astype(jnp.bfloat16).astype(jnp.float32)
    h1 = jax.nn.relu(bf(image_batch) @ bf(w1) + b1)
    enriched_a, enriched_b = bf(h1), bf(extras_batch)          # == concat, folded
    h2 = jax.nn.relu(enriched_a @ bf(w2a) + enriched_b @ bf(w2b) + b2)
    return bf(h2) @ bf(w3) + b3


if __name__ == "__main__":
    image_dim, inner_dim, outer_dim = 16, 8, 32

    key = jax.random.PRNGKey(0)
    k_img, k_ext, k_param = jax.random.split(key, 3)
    params = init_params(k_param, image_dim, inner_dim, outer_dim)

    # Small demo batch (single grid step).
    batch = 8
    image_batch = jax.random.normal(k_img, (batch, image_dim), jnp.float32)
    extras_batch = jax.random.normal(k_ext, (batch, inner_dim), jnp.float32)

    out = mymodel_forward(image_batch, extras_batch, params)
    out = jax.block_until_ready(out)
    ref = reference_forward(image_batch, extras_batch, params)
    assert out.shape == (batch, outer_dim)
    assert jnp.allclose(out, ref, atol=1e-3, rtol=1e-3), "mismatch vs reference (B=8)"

    # Exercise the multi-tile grid path (4 batch tiles of 16 rows).
    batch2 = 64
    img2 = jax.random.normal(jax.random.PRNGKey(1), (batch2, image_dim), jnp.float32)
    ext2 = jax.random.normal(jax.random.PRNGKey(2), (batch2, inner_dim), jnp.float32)
    out2 = jax.block_until_ready(mymodel_forward(img2, ext2, params, b_tile=16))
    ref2 = reference_forward(img2, ext2, params)
    assert out2.shape == (batch2, outer_dim)
    assert jnp.allclose(out2, ref2, atol=1e-3, rtol=1e-3), "mismatch vs reference (B=64)"

    print("KERNEL_OK")
</pallas_src>

<mosaic_0001>
module attributes {stable_mosaic.version = 11 : i64} {
  func.func @_mlp_kernel(%arg0: i32, %arg1: memref<16x16xbf16, #tpu.memory_space<vmem>>, %arg2: memref<16x8xbf16, #tpu.memory_space<vmem>>, %arg3: memref<16x10xbf16, #tpu.memory_space<vmem>>, %arg4: memref<1x10xf32, #tpu.memory_space<vmem>>, %arg5: memref<10x10xbf16, #tpu.memory_space<vmem>>, %arg6: memref<8x10xbf16, #tpu.memory_space<vmem>>, %arg7: memref<1x10xf32, #tpu.memory_space<vmem>>, %arg8: memref<10x128xbf16, #tpu.memory_space<vmem>>, %arg9: memref<1x128xf32, #tpu.memory_space<vmem>>, %arg10: memref<16x128xf32, #tpu.memory_space<vmem>>) attributes {dimension_semantics = [#tpu.dimension_semantics<parallel>], iteration_bounds = array<i64: 1>, scalar_prefetch = 0 : i64, scratch_operands = 0 : i64, tpu.core_type = #tpu.core_type<tc>, window_params = [{transform_indices = @transform_0, window_bounds = array<i64: 16, 16>}, {transform_indices = @transform_1, window_bounds = array<i64: 16, 8>}, {pipeline_mode = #tpu.pipeline_mode<synchronous>, transform_indices = @transform_2, window_bounds = array<i64: 16, 10>}, {pipeline_mode = #tpu.pipeline_mode<synchronous>, transform_indices = @transform_3, window_bounds = array<i64: 1, 10>}, {pipeline_mode = #tpu.pipeline_mode<synchronous>, transform_indices = @transform_4, window_bounds = array<i64: 10, 10>}, {pipeline_mode = #tpu.pipeline_mode<synchronous>, transform_indices = @transform_5, window_bounds = array<i64: 8, 10>}, {pipeline_mode = #tpu.pipeline_mode<synchronous>, transform_indices = @transform_6, window_bounds = array<i64: 1, 10>}, {pipeline_mode = #tpu.pipeline_mode<synchronous>, transform_indices = @transform_7, window_bounds = array<i64: 10, 128>}, {pipeline_mode = #tpu.pipeline_mode<synchronous>, transform_indices = @transform_8, window_bounds = array<i64: 1, 128>}, {transform_indices = @transform_9, window_bounds = array<i64: 16, 128>}]} {
    %c0 = arith.constant 0 : index
    %c0_0 = arith.constant 0 : index
    %0 = vector.load %arg1[%c0, %c0_0] : memref<16x16xbf16, #tpu.memory_space<vmem>>, vector<16x16xbf16>
    %c0_1 = arith.constant 0 : index
    %c0_2 = arith.constant 0 : index
    %1 = vector.load %arg2[%c0_1, %c0_2] : memref<16x8xbf16, #tpu.memory_space<vmem>>, vector<16x8xbf16>
    %c0_3 = arith.constant 0 : index
    %c0_4 = arith.constant 0 : index
    %2 = vector.load %arg3[%c0_3, %c0_4] : memref<16x10xbf16, #tpu.memory_space<vmem>>, vector<16x10xbf16>
    %cst = arith.constant dense<0.000000e+00> : vector<16x10xf32>
    %3 = tpu.matmul %0, %2, %cst {dimension_numbers = #tpu.dot_dimension_numbers<[1], [0], [0], [1], [0, 0, 1, 1], [], []>} : vector<16x16xbf16>, vector<16x10xbf16>, vector<16x10xf32> -> vector<16x10xf32>
    %c0_5 = arith.constant 0 : index
    %c0_6 = arith.constant 0 : index
    %4 = vector.load %arg4[%c0_5, %c0_6] : memref<1x10xf32, #tpu.memory_space<vmem>>, vector<1x10xf32>
    %5 = vector.broadcast %4 : vector<1x10xf32> to vector<16x10xf32>
    %6 = arith.addf %3, %5 : vector<16x10xf32>
    %cst_7 = arith.constant 0.000000e+00 : f32
    %7 = vector.broadcast %cst_7 : f32 to vector<16x10xf32>
    %8 = arith.maximumf %6, %7 : vector<16x10xf32>
    %9 = arith.truncf %8 : vector<16x10xf32> to vector<16x10xbf16>
    %c0_8 = arith.constant 0 : index
    %c0_9 = arith.constant 0 : index
    %10 = vector.load %arg5[%c0_8, %c0_9] : memref<10x10xbf16, #tpu.memory_space<vmem>>, vector<10x10xbf16>
    %cst_10 = arith.constant dense<0.000000e+00> : vector<16x10xf32>
    %11 = tpu.matmul %9, %10, %cst_10 {dimension_numbers = #tpu.dot_dimension_numbers<[1], [0], [0], [1], [0, 0, 1, 1], [], []>} : vector<16x10xbf16>, vector<10x10xbf16>, vector<16x10xf32> -> vector<16x10xf32>
    %c0_11 = arith.constant 0 : index
    %c0_12 = arith.constant 0 : index
    %12 = vector.load %arg6[%c0_11, %c0_12] : memref<8x10xbf16, #tpu.memory_space<vmem>>, vector<8x10xbf16>
    %cst_13 = arith.constant dense<0.000000e+00> : vector<16x10xf32>
    %13 = tpu.matmul %1, %12, %cst_13 {dimension_numbers = #tpu.dot_dimension_numbers<[1], [0], [0], [1], [0, 0, 1, 1], [], []>} : vector<16x8xbf16>, vector<8x10xbf16>, vector<16x10xf32> -> vector<16x10xf32>
    %14 = arith.addf %11, %13 : vector<16x10xf32>
    %c0_14 = arith.constant 0 : index
    %c0_15 = arith.constant 0 : index
    %15 = vector.load %arg7[%c0_14, %c0_15] : memref<1x10xf32, #tpu.memory_space<vmem>>, vector<1x10xf32>
    %16 = vector.broadcast %15 : vector<1x10xf32> to vector<16x10xf32>
    %17 = arith.addf %14, %16 : vector<16x10xf32>
    %cst_16 = arith.constant 0.000000e+00 : f32
    %18 = vector.broadcast %cst_16 : f32 to vector<16x10xf32>
    %19 = arith.maximumf %17, %18 : vector<16x10xf32>
    %20 = arith.truncf %19 : vector<16x10xf32> to vector<16x10xbf16>
    %c0_17 = arith.constant 0 : index
    %c0_18 = arith.constant 0 : index
    %21 = vector.load %arg8[%c0_17, %c0_18] : memref<10x128xbf16, #tpu.memory_space<vmem>>, vector<10x128xbf16>
    %cst_19 = arith.constant dense<0.000000e+00> : vector<16x128xf32>
    %22 = tpu.matmul %20, %21, %cst_19 {dimension_numbers = #tpu.dot_dimension_numbers<[1], [0], [0], [1], [0, 0, 1, 1], [], []>} : vector<16x10xbf16>, vector<10x128xbf16>, vector<16x128xf32> -> vector<16x128xf32>
    %c0_20 = arith.constant 0 : index
    %c0_21 = arith.constant 0 : index
    %23 = vector.load %arg9[%c0_20, %c0_21] : memref<1x128xf32, #tpu.memory_space<vmem>>, vector<1x128xf32>
    %24 = vector.broadcast %23 : vector<1x128xf32> to vector<16x128xf32>
    %25 = arith.addf %22, %24 : vector<16x128xf32>
    %c0_22 = arith.constant 0 : index
    %c0_23 = arith.constant 0 : index
    %26 = vector.load %arg10[%c0_22, %c0_23] : memref<16x128xf32, #tpu.memory_space<vmem>>, vector<16x128xf32>
    tpu.vector_store %arg10[%c0_22, %c0_23], %25 {strides = array<i32>} : memref<16x128xf32, #tpu.memory_space<vmem>>, vector<16x128xf32>,
    return
  }
  func.func @transform_0(%arg0: i32) -> (i32, i32) {
    %c0_i32 = arith.constant 0 : i32
    %c0_i32_0 = arith.constant 0 : i32
    return %arg0, %c0_i32 : i32, i32
  }
  func.func @transform_1(%arg0: i32) -> (i32, i32) {
    %c0_i32 = arith.constant 0 : i32
    %c0_i32_0 = arith.constant 0 : i32
    return %arg0, %c0_i32 : i32, i32
  }
  func.func @transform_2(%arg0: i32) -> (i32, i32) {
    %c0_i32 = arith.constant 0 : i32
    %c0_i32_0 = arith.constant 0 : i32
    %c0_i32_1 = arith.constant 0 : i32
    return %c0_i32, %c0_i32_0 : i32, i32
  }
  func.func @transform_3(%arg0: i32) -> (i32, i32) {
    %c0_i32 = arith.constant 0 : i32
    %c0_i32_0 = arith.constant 0 : i32
    %c0_i32_1 = arith.constant 0 : i32
    return %c0_i32, %c0_i32_0 : i32, i32
  }
  func.func @transform_4(%arg0: i32) -> (i32, i32) {
    %c0_i32 = arith.constant 0 : i32
    %c0_i32_0 = arith.constant 0 : i32
    %c0_i32_1 = arith.constant 0 : i32
    return %c0_i32, %c0_i32_0 : i32, i32
  }
  func.func @transform_5(%arg0: i32) -> (i32, i32) {
    %c0_i32 = arith.constant 0 : i32
    %c0_i32_0 = arith.constant 0 : i32
    %c0_i32_1 = arith.constant 0 : i32
    return %c0_i32, %c0_i32_0 : i32, i32
  }
  func.func @transform_6(%arg0: i32) -> (i32, i32) {
    %c0_i32 = arith.constant 0 : i32
    %c0_i32_0 = arith.constant 0 : i32
    %c0_i32_1 = arith.constant 0 : i32
    return %c0_i32, %c0_i32_0 : i32, i32
  }
  func.func @transform_7(%arg0: i32) -> (i32, i32) {
    %c0_i32 = arith.constant 0 : i32
    %c0_i32_0 = arith.constant 0 : i32
    %c0_i32_1 = arith.constant 0 : i32
    return %c0_i32, %c0_i32_0 : i32, i32
  }
  func.func @transform_8(%arg0: i32) -> (i32, i32) {
    %c0_i32 = arith.constant 0 : i32
    %c0_i32_0 = arith.constant 0 : i32
    %c0_i32_1 = arith.constant 0 : i32
    return %c0_i32, %c0_i32_0 : i32, i32
  }
  func.func @transform_9(%arg0: i32) -> (i32, i32) {
    %c0_i32 = arith.constant 0 : i32
    %c0_i32_0 = arith.constant 0 : i32
    return %arg0, %c0_i32 : i32, i32
  }
}

</mosaic_0001>

<bundles_post_ra>
// kernel: mymodel_forward.1
= control target key start
LH: loop header
LB: loop body
LE: loop exit
PB: predicated region body
PF: predicated region fallthrough
CT: control target
= control target key end

     0   :  { %v346_v0 = vmov 0.0   ;;  %vm347_vm0 = vmmov 0   ;;  %vm57_vm1 = vcmask 130048   ;;  %vm117_vm2 = vcmask 1043456   ;;  %s439_s2 = inlined_call_operand.vmem [shape: bf16[16,10], index: 2, kind: input, shape index: {}]   ;;  %s440_s0 = inlined_call_operand.vmem [shape: bf16[16,16], index: 0, kind: input, shape index: {}]   ;;  %s441_s5 = inlined_call_operand.vmem [shape: bf16[8,10], index: 5, kind: input, shape index: {}]   ;;  %s442_s4 = inlined_call_operand.vmem [shape: bf16[10,10], index: 4, kind: input, shape index: {}]   ;;  %s443_s1 = inlined_call_operand.vmem [shape: bf16[16,8], index: 1, kind: input, shape index: {}]   ;;  %s444_s3 = inlined_call_operand.vmem [shape: f32[1,10], index: 3, kind: input, shape index: {}]   ;;  %s445_s7 = inlined_call_operand.vmem [shape: bf16[10,128], index: 7, kind: input, shape index: {}]   ;;  %s446_s6 = inlined_call_operand.vmem [shape: f32[1,10], index: 6, kind: input, shape index: {}]   ;;  %s447_s8 = inlined_call_operand.vmem [shape: f32[1,128], index: 8, kind: input, shape index: {}]   ;;  %s448_s9 = inlined_call_operand.vmem [shape: f32[16,128], index: 9, kind: output, shape index: {}]  }
   0x1   :  { %315 = vmatprep.subr.bf16.mxu0 %v346_v0  ;;  %v341_v1 = vld [vmem:[%s439_s2] sm:$0xff]   ;;  %317 = vmatprep.mubr.msk.bf16.mxu0 %vm347_vm0, %v346_v0  ;;  %vm171_vm3 = vcmask 1044480   ;;  %vm113_vm4 = vcmask 64512   ;;  %vm167_vm5 = vcmask 80896  }
   0x2   :  { %v342_v2 = vld [vmem:[%s440_s0] sm:$0xff]   ;;  %321 = vmatprep.subr.bf16.mxu1 %v346_v0  ;;  %323 = vmatprep.mubr.msk.bf16.mxu1 %vm347_vm0, %v346_v0 }
   0x3   :  { %316 = vmatpush3.bf16.msra.mxu0 %v341_v1  ;;  %v107_v3 = vld [vmem:[%s441_s5] sm:$0xf] }
   0x4   :  { %327 = vmatprep.subr.bf16.mxu0 %v346_v0  ;;  %v119_v4 = vsel %vm117_vm2, %v107_v3, 0  ;;  %v343_v5 = vld [vmem:[%s442_s4] sm:$0x1f]  }
   0x5   :  { %322 = vmatpush3.bf16.msra.mxu1 %v119_v4  ;;  %v344_v6 = vld [vmem:[%s443_s1] sm:$0xff]   ;;  %v173_v7 = vsel %vm171_vm3, %v343_v5, 0 }
   0x6   :  { %318 = vmatmul.mubr.msk.bf16.vlgmr.msra.gmra.mrb[0].mxu0 %vm57_vm1, %v342_v2  ;;  %333 = vmatprep.subr.bf16.mxu1 %v346_v0  ;;  %v295_v8 = vld [vmem:[%s444_s3] ss:$0 sm:$0xff] }
   0x7   :  { %329 = vmatprep.mubr.msk.bf16.mxu0 %vm347_vm0, %v346_v0  ;;  %328 = vmatpush3.bf16.msra.mxu0 %v173_v7  ;;  %v345_v22 = vld [vmem:[%s445_s7] sm:$0x1f]  }
   0x8   :  { %324 = vmatmul.mubr.msk.bf16.vlgmr.msra.gmra.mrb[0].mxu1 %vm113_vm4, %v344_v6  ;;  %v246_v23 = vsel %vm171_vm3, %v345_v22, 0  ;;  %v303_v25 = vld [vmem:[%s446_s6] ss:$0 sm:$0xff] }
   0x9   :  { %335 = vmatprep.mubr.msk.bf16.mxu1 %vm347_vm0, %v346_v0  ;;  %334 = vmatpush3.bf16.msra.mxu1 %v246_v23  ;;  %v304_v36 = vld [vmem:[%s447_s8] ss:$0 sm:$0xff] }
  0xd9   :  { %v95_v9 = vpop.f32.mrb[0].mxu0 }
  0xda   :  { %v96_v10 = vadd.f32 %v295_v8, %v95_v9  ;;  %v319_v11 = vpop.f32.mrb[1].mxu0 }
  0xdb   :  { %v98_v12 = vpop.f32.mrb[2].mxu0  ;;  %v155_v18 = vpop.f32.mrb[0].mxu1 }
  0xdc   :  { %v99_v13 = vadd.f32 %v295_v8, %v98_v12  ;;  %v320_v14 = vpop.f32.mrb[3].mxu0  ;;  %v102_v15 = vmax.f32 %v96_v10, 0.0  ;;  %v325_v19 = vpop.f32.mrb[1].mxu1 }
  0xdd   :  { %v158_v20 = vpop.f32.mrb[2].mxu1 }
  0xde   :  { %v103_v16 = vmax.f32 %v99_v13, 0.0  ;;  %v326_v21 = vpop.f32.mrb[3].mxu1 }
  0xe0   :  { %v104_v17 = vpack.c.bf16 %v103_v16, %v102_v15 }
  0xe2   :  { %330 = vmatmul.mubr.msk.bf16.vlgmr.msra.gmra.mrb[4].mxu0 %vm167_vm5, %v104_v17 }
 0x1b5   :  { %v209_v24 = vpop.f32.mrb[4].mxu0 }
 0x1b6   :  { %v210_v26 = vadd.f32 %v209_v24, %v155_v18  ;;  %v331_v27 = vpop.f32.mrb[5].mxu0 }
 0x1b7   :  { %v212_v28 = vpop.f32.mrb[6].mxu0 }
 0x1b8   :  { %v223_v29 = vadd.f32 %v303_v25, %v210_v26  ;;  %v213_v30 = vadd.f32 %v212_v28, %v158_v20  ;;  %v332_v31 = vpop.f32.mrb[7].mxu0 }
 0x1ba   :  { %v224_v32 = vadd.f32 %v303_v25, %v213_v30  ;;  %v225_v33 = vmax.f32 %v223_v29, 0.0 }
 0x1bc   :  { %v226_v34 = vmax.f32 %v224_v32, 0.0 }
 0x1be   :  { %v227_v35 = vpack.c.bf16 %v226_v34, %v225_v33 }
 0x1c0   :  { %336 = vmatmul.mubr.msk.bf16.vlgmr.msra.gmra.mrb[4].mxu1 %vm167_vm5, %v227_v35 }
 0x293   :  { %v282_v37 = vpop.f32.mrb[4].mxu1 }
 0x294   :  { %v283_v38 = vadd.f32 %v304_v36, %v282_v37  ;;  %v337_v39 = vpop.f32.mrb[5].mxu1 }
 0x295   :  { %v285_v40 = vpop.f32.mrb[6].mxu1 }
 0x296   :  { %289 = vst [vmem:[%s448_s9] sm:$0xff] %v283_v38  ;;  %v286_v41 = vadd.f32 %v304_v36, %v285_v40  ;;  %v338_v42 = vpop.f32.mrb[7].mxu1 }
 0x298   :  { %290 = vst [vmem:[%s448_s9 + $0x8] sm:$0xff] %v286_v41 }

</bundles_post_ra>
